<compile_context>
chip_gen: v6e
topology: v6e:2x2x1
jax: 0.10.0
libtpu: 0.0.40
codegen_flags: <defaults>
</compile_context>

<pallas_src>
import functools

import jax
import jax.numpy as jnp
from jax.experimental import pallas as pl
from jax.experimental.pallas import tpu as pltpu

EPS = 1e-6
NEG_INF = -1e30  # finite "masked" value: avoids NaN from (-inf) - (-inf)


# ----------------------------- tiling helpers -----------------------------

def _pick_tile(dim, target, preferred_multiple=128):
    """Largest tile <= target that divides dim, preferring multiples of 128
    (lane) then 8 (sublane); otherwise the full dim (always a legal block)."""
    if dim <= target:
        return dim
    for mult in (preferred_multiple, 8):
        if mult > target:
            continue
        t = (target // mult) * mult
        while t >= mult:
            if dim % t == 0:
                return t
            t -= mult
    return dim


def _vmem_capacity_bytes():
    try:
        info = pltpu.get_tpu_info()
        cap = getattr(info, "vmem_capacity_bytes", None)
        if cap:
            return int(cap)
    except Exception:
        pass
    return 128 << 20


_VMEM_CAP = _vmem_capacity_bytes()
_SMALL_VMEM = _VMEM_CAP <= (64 << 20)            # v7x-class (64 MiB VMEM)
_VMEM_LIMIT = min(int(_VMEM_CAP * 3 // 4), 100 << 20)
# Generation-aware tile targets: shrink on v7x, keep large elsewhere.
_TM = 128 if _SMALL_VMEM else 256
_TN = 256 if _SMALL_VMEM else 512
_TH = 256 if _SMALL_VMEM else 512
# TODO(synk): on v5e (4x128x128 MXU) a tq target of 128 would be marginally
#             better than 256; generation cannot be distinguished from VMEM
#             capacity alone, so 256 is used for v6e/v7x MXU fill.
_TQ = 256
_TKV = 256


def _mosaic_params(*semantics):
    return pltpu.CompilerParams(dimension_semantics=tuple(semantics),
                                vmem_limit_bytes=_VMEM_LIMIT)


# ------ fused RMSNorm(norm1) + QKV projection + QK-RMSNorm + RoPE kernel ------

def _norm_qkv_rope_kernel(x_ref, n1_ref, qn_ref, kn_ref, cos_ref, sin_ref,
                          w_ref, o_ref, xn_ref, *, n_q_heads, n_kv_heads,
                          head_dim, sm_scale, use_qk_norm):
    n = pl.program_id(2)                         # packed head index (q..k..v)
    D = head_dim

    # norm1 computed once per row tile, cached across the head axis
    @pl.when(n == 0)
    def _():
        x = x_ref[0].astype(jnp.float32)
        var = jnp.mean(x * x, axis=-1, keepdims=True)
        xn = x * jax.lax.rsqrt(var + EPS) * n1_ref[...].astype(jnp.float32)
        xn_ref[...] = xn.astype(xn_ref.dtype)

    # per-head projection: (ts, E) @ (E, D) on the MXU, f32 accumulation
    y = jnp.dot(xn_ref[...], w_ref[0], preferred_element_type=jnp.float32)

    @pl.when(n >= n_q_heads + n_kv_heads)        # V heads: plain projection
    def _():
        o_ref[0, 0] = y.astype(o_ref.dtype)

    @pl.when(n < n_q_heads + n_kv_heads)         # Q / K heads: QK-norm + RoPE
    def _():
        is_q = n < n_q_heads
        z = y
        if use_qk_norm:
            scale = jnp.where(is_q, qn_ref[...], kn_ref[...]).astype(jnp.float32)
            var = jnp.mean(z * z, axis=-1, keepdims=True)
            z = z * jax.lax.rsqrt(var + EPS) * scale
        cos = cos_ref[...].astype(jnp.float32)
        sin = sin_ref[...].astype(jnp.float32)
        if D >= 128:
            # rotate_half via the XLU roll instead of lane-crossing slices/concat
            rot = pltpu.roll(z, D // 2, axis=-1)
            lane = jax.lax.broadcasted_iota(jnp.int32, z.shape, 1)
            rot = jnp.where(lane < D // 2, -rot, rot)
        else:
            z1 = z[:, : D // 2]
            z2 = z[:, D // 2:]
            rot = jnp.concatenate([-z2, z1], axis=-1)
        z = z * cos + rot * sin
        # fold 1/sqrt(D) into q once here instead of per KV step in attention
        z = z * jnp.where(is_q, sm_scale, 1.0)
        o_ref[0, 0] = z.astype(o_ref.dtype)


def fused_norm_qkv_rope(x, norm1_scale, q_norm_scale, k_norm_scale, cos_s,
                        sin_s, w_qkv, *, n_q_heads, n_kv_heads, head_dim,
                        use_qk_norm):
    # x: (B, S, E); w_qkv: (NH, E, D) pre-packed head-major (q..k..v heads).
    B, S, E = x.shape
    NH = w_qkv.shape[0]
    D = head_dim
    ts = _pick_tile(S, _TM)
    sm_scale = 1.0 / float(D) ** 0.5
    kernel = functools.partial(
        _norm_qkv_rope_kernel, n_q_heads=n_q_heads, n_kv_heads=n_kv_heads,
        head_dim=D, sm_scale=sm_scale, use_qk_norm=use_qk_norm)
    return pl.pallas_call(
        kernel,
        out_shape=jax.ShapeDtypeStruct((NH, B, S, D), x.dtype),
        grid=(B, S // ts, NH),
        in_specs=[
            pl.BlockSpec((1, ts, E), lambda b, st, n: (b, st, 0)),
            pl.BlockSpec((1, E), lambda b, st, n: (0, 0)),
            pl.BlockSpec((1, D), lambda b, st, n: (0, 0)),
            pl.BlockSpec((1, D), lambda b, st, n: (0, 0)),
            pl.BlockSpec((ts, D), lambda b, st, n: (st, 0)),
            pl.BlockSpec((ts, D), lambda b, st, n: (st, 0)),
            pl.BlockSpec((1, E, D), lambda b, st, n: (n, 0, 0)),
        ],
        out_specs=pl.BlockSpec((1, 1, ts, D), lambda b, st, n: (n, b, st, 0)),
        scratch_shapes=[pltpu.VMEM((ts, E), x.dtype)],   # cached norm1 output
        compiler_params=_mosaic_params("parallel", "parallel", "arbitrary"),
    )(x, norm1_scale.reshape(1, E), q_norm_scale.reshape(1, D),
      k_norm_scale.reshape(1, D), cos_s, sin_s, w_qkv)


# ---------------- flash-style GQA attention (online softmax) ----------------

def _flash_gqa_kernel(q_ref, k_ref, v_ref, o_ref, m_ref, l_ref, acc_ref, *,
                      group, tq, tk, start_pos):
    qt = pl.program_id(2)
    kvt = pl.program_id(3)
    G = group

    @pl.when(kvt == 0)
    def _():
        m_ref[...] = jnp.full_like(m_ref, NEG_INF)
        l_ref[...] = jnp.zeros_like(l_ref)
        acc_ref[...] = jnp.zeros_like(acc_ref)

    q_pos0 = start_pos + qt * tq     # absolute position of first query row
    k_pos0 = kvt * tk                # absolute position of first key in block

    # Skip compute for KV blocks entirely in the causal future of this q block
    # (the K/V index_map also clamps so those blocks are never DMA'd).
    @pl.when(k_pos0 <= q_pos0 + tq - 1)
    def _():
        k = k_ref[0, 0]
        v = v_ref[0, 0]
        q_ids = q_pos0 + jax.lax.broadcasted_iota(jnp.int32, (tq, tk), 0)
        k_ids = k_pos0 + jax.lax.broadcasted_iota(jnp.int32, (tq, tk), 1)
        future = k_ids > q_ids                       # shared by all G heads
        # All G query heads of this KV group reuse the same K/V tile.
        # TODO(synk): stack the G heads into a single (G*tq, D) MXU operand
        #             once value reshapes across the sublane dim are cheap.
        for g in range(G):
            q = q_ref[g, 0]                          # (tq, D), 1/sqrt(D) pre-folded
            s = jax.lax.dot_general(q, k, (((1,), (1,)), ((), ())),
                                    preferred_element_type=jnp.float32)
            s = jnp.where(future, NEG_INF, s)
            m_prev = m_ref[g]
            m_new = jnp.maximum(m_prev, jnp.max(s, axis=-1, keepdims=True))
            alpha = jnp.exp(m_prev - m_new)
            p = jnp.exp(s - m_new)
            l_ref[g] = alpha * l_ref[g] + jnp.sum(p, axis=-1, keepdims=True)
            acc_ref[g] = alpha * acc_ref[g] + jnp.dot(
                p.astype(v.dtype), v, preferred_element_type=jnp.float32)
            m_ref[g] = m_new

    @pl.when(kvt == pl.num_programs(3) - 1)
    def _():
        for g in range(G):
            inv = pl.reciprocal(l_ref[g], approx=True)
            o_ref[g, 0] = (acc_ref[g] * inv).astype(o_ref.dtype)


def flash_gqa_attention(q_all, keys, values, *, n_heads, n_kv_groups,
                        start_pos=0):
    # q_all: (NH_or_H, B, Sq, D) head-major, q heads in rows [0, n_heads)
    # keys/values: (B, KV, Skv, D)
    _, B, Sq, D = q_all.shape
    Skv = keys.shape[2]
    G = n_heads // n_kv_groups
    tq = _pick_tile(Sq, _TQ)
    tk = _pick_tile(Skv, _TKV)
    kernel = functools.partial(_flash_gqa_kernel, group=G, tq=tq, tk=tk,
                               start_pos=start_pos)

    def kv_index_map(b, kv, qt, kvt):
        # Clamp so causally-skipped KV tiles repeat the previous block index
        # and are therefore never re-DMA'd (compute is skipped in-kernel).
        last_needed = (start_pos + (qt + 1) * tq - 1) // tk
        return (b, kv, jnp.minimum(kvt, last_needed), 0)

    return pl.pallas_call(
        kernel,
        out_shape=jax.ShapeDtypeStruct((n_heads, B, Sq, D), q_all.dtype),
        grid=(B, n_kv_groups, Sq // tq, Skv // tk),
        in_specs=[
            pl.BlockSpec((G, 1, tq, D), lambda b, kv, qt, kvt: (kv, b, qt, 0)),
            pl.BlockSpec((1, 1, tk, D), kv_index_map),
            pl.BlockSpec((1, 1, tk, D), kv_index_map),
        ],
        out_specs=pl.BlockSpec((G, 1, tq, D),
                               lambda b, kv, qt, kvt: (kv, b, qt, 0)),
        scratch_shapes=[
            pltpu.VMEM((G, tq, 1), jnp.float32),   # running max
            pltpu.VMEM((G, tq, 1), jnp.float32),   # running sum
            pltpu.VMEM((G, tq, D), jnp.float32),   # f32 output accumulator
        ],
        compiler_params=_mosaic_params("parallel", "parallel", "parallel",
                                       "arbitrary"),
    )(q_all, keys, values)


# ------------- out-projection over the head axis + fused residual -------------

def _outproj_residual_kernel(ctx_ref, w_ref, res_ref, o_ref, acc_ref):
    h = pl.program_id(2)

    @pl.when(h == 0)
    def _():
        acc_ref[...] = jnp.zeros_like(acc_ref)

    acc_ref[...] += jnp.dot(ctx_ref[0], w_ref[0],
                            preferred_element_type=jnp.float32)

    @pl.when(h == pl.num_programs(2) - 1)
    def _():
        o_ref[...] = (acc_ref[...] +
                      res_ref[...].astype(jnp.float32)).astype(o_ref.dtype)


def outproj_residual(ctx, w_out, res2d):
    # ctx: (H, M, D) head-major (no relayout of the attention output needed);
    # w_out: (H, D, E); res2d: (M, E)
    Hn, M, D = ctx.shape
    E = w_out.shape[2]
    tm = _pick_tile(M, _TM)
    tn = _pick_tile(E, _TN)
    return pl.pallas_call(
        _outproj_residual_kernel,
        out_shape=jax.ShapeDtypeStruct((M, E), res2d.dtype),
        grid=(M // tm, E // tn, Hn),
        in_specs=[
            pl.BlockSpec((1, tm, D), lambda i, j, h: (h, i, 0)),
            pl.BlockSpec((1, D, tn), lambda i, j, h: (h, 0, j)),
            pl.BlockSpec((tm, tn), lambda i, j, h: (i, j)),
        ],
        out_specs=pl.BlockSpec((tm, tn), lambda i, j, h: (i, j)),
        scratch_shapes=[pltpu.VMEM((tm, tn), jnp.float32)],
        compiler_params=_mosaic_params("parallel", "parallel", "arbitrary"),
    )(ctx, w_out, res2d)


# ---------- fused RMSNorm(norm2) + SwiGLU feed-forward + fc3 + residual ----------

def _ffn_kernel(x_ref, scale_ref, w1_ref, w2_ref, w3_ref, res_ref, o_ref,
                xn_ref, acc_ref):
    j = pl.program_id(1)

    @pl.when(j == 0)
    def _():
        x = x_ref[...].astype(jnp.float32)
        var = jnp.mean(x * x, axis=-1, keepdims=True)
        xn = x * jax.lax.rsqrt(var + EPS) * scale_ref[...].astype(jnp.float32)
        xn_ref[...] = xn.astype(xn_ref.dtype)
        acc_ref[...] = jnp.zeros_like(acc_ref)

    xn = xn_ref[...]
    h1 = jnp.dot(xn, w1_ref[...], preferred_element_type=jnp.float32)
    h2 = jnp.dot(xn, w2_ref[...], preferred_element_type=jnp.float32)
    h = (h1 * jax.nn.sigmoid(h1)) * h2        # SiLU(fc1) * fc2 in f32
    acc_ref[...] += jnp.dot(h.astype(w3_ref.dtype), w3_ref[...],
                            preferred_element_type=jnp.float32)

    @pl.when(j == pl.num_programs(1) - 1)
    def _():
        o_ref[...] = (acc_ref[...] +
                      res_ref[...].astype(jnp.float32)).astype(o_ref.dtype)


def fused_ffn(x2d, scale, w1, w2, w3, res2d):
    M, E = x2d.shape
    HID = w1.shape[1]
    tm = _pick_tile(M, _TM)
    th = _pick_tile(HID, _TH)
    return pl.pallas_call(
        _ffn_kernel,
        out_shape=jax.ShapeDtypeStruct((M, E), x2d.dtype),
        grid=(M // tm, HID // th),
        in_specs=[
            pl.BlockSpec((tm, E), lambda i, j: (i, 0)),
            pl.BlockSpec((1, E), lambda i, j: (0, 0)),
            pl.BlockSpec((E, th), lambda i, j: (0, j)),
            pl.BlockSpec((E, th), lambda i, j: (0, j)),
            pl.BlockSpec((th, E), lambda i, j: (j, 0)),
            pl.BlockSpec((tm, E), lambda i, j: (i, 0)),
        ],
        out_specs=pl.BlockSpec((tm, E), lambda i, j: (i, 0)),
        scratch_shapes=[
            pltpu.VMEM((tm, E), x2d.dtype),    # normalized activations (reused over j)
            pltpu.VMEM((tm, E), jnp.float32),  # f32 accumulator for fc3
        ],
        compiler_params=_mosaic_params("parallel", "arbitrary"),
    )(x2d, scale.reshape(1, E), w1, w2, w3, res2d)


# -------------------------- TransformerBlock glue --------------------------

def init_params(key, cfg):
    E = cfg["emb_dim"]
    H = cfg["n_heads"]
    KV = cfg["n_kv_groups"]
    D = cfg["head_dim"]
    HID = cfg["hidden_dim"]
    dtype = cfg["dtype"]
    NH = H + 2 * KV
    ks = jax.random.split(key, 7)

    def w(k, shape):
        return (0.02 * jax.random.normal(k, shape, dtype=jnp.float32)).astype(dtype)

    wq = w(ks[0], (E, H * D))
    wk = w(ks[1], (E, KV * D))
    wv = w(ks[2], (E, KV * D))
    # Pre-pack QKV head-major once at init: (NH, E, D), heads ordered [q..k..v].
    w_qkv = jnp.concatenate([wq, wk, wv], axis=1).reshape(E, NH, D).transpose(1, 0, 2)

    return {
        "w_qkv": w_qkv,
        "w_out": w(ks[3], (H * D, E)),
        "w_fc1": w(ks[4], (E, HID)),
        "w_fc2": w(ks[5], (E, HID)),
        "w_fc3": w(ks[6], (HID, E)),
        "norm1_scale": jnp.ones((E,), jnp.float32),
        "norm2_scale": jnp.ones((E,), jnp.float32),
        "q_norm_scale": jnp.ones((D,), jnp.float32),
        "k_norm_scale": jnp.ones((D,), jnp.float32),
    }


def compute_rope_params(head_dim, theta_base=10000.0, context_length=16):
    inv_freq = 1.0 / (theta_base ** (jnp.arange(0, head_dim, 2, dtype=jnp.float32) / head_dim))
    positions = jnp.arange(context_length, dtype=jnp.float32)
    angles = positions[:, None] * inv_freq[None, :]        # (ctx, D/2)
    angles = jnp.concatenate([angles, angles], axis=-1)    # (ctx, D)
    return jnp.cos(angles), jnp.sin(angles)


def transformer_block_forward(params, cfg, x, mask, cos, sin, start_pos=0, cache=None):
    B, S, E = x.shape
    H = cfg["n_heads"]
    KV = cfg["n_kv_groups"]
    D = cfg["head_dim"]
    G = H // KV
    dtype = cfg["dtype"]
    x = x.astype(dtype)

    # TODO(synk): only the standard causal mask is built in-kernel (iota-based);
    #             an arbitrary caller-provided `mask` is accepted for API parity
    #             but is not threaded into the attention kernel.
    del mask

    cos_s = jax.lax.dynamic_slice_in_dim(cos, start_pos, S, axis=0)
    sin_s = jax.lax.dynamic_slice_in_dim(sin, start_pos, S, axis=0)

    # norm1 + QKV projection + QK-RMSNorm + RoPE + 1/sqrt(D), head-major output
    qkv = fused_norm_qkv_rope(
        x, params["norm1_scale"], params["q_norm_scale"], params["k_norm_scale"],
        cos_s, sin_s, params["w_qkv"],
        n_q_heads=H, n_kv_heads=KV, head_dim=D,
        use_qk_norm=bool(cfg["qk_norm"]))                    # (NH, B, S, D)

    k_new = qkv[H:H + KV].transpose(1, 0, 2, 3)              # (B, KV, S, D)
    v_new = qkv[H + KV:].transpose(1, 0, 2, 3)

    if cache is not None:
        prev_k, prev_v = cache
        keys = jnp.concatenate([prev_k, k_new], axis=2)
        values = jnp.concatenate([prev_v, v_new], axis=2)
        attn_start = start_pos
    else:
        keys, values = k_new, v_new
        attn_start = 0                        # mirrors the PyTorch reference
    next_cache = (keys, values)

    # q heads are the first H rows of qkv; pass qkv directly (no Q relayout)
    # when the group size tiles the packed head axis evenly, else slice.
    q_all = qkv if qkv.shape[0] % G == 0 else qkv[:H]
    ctx = flash_gqa_attention(q_all, keys, values, n_heads=H, n_kv_groups=KV,
                              start_pos=attn_start)          # (H, B, S, D)

    x2d = x.reshape(B * S, E)
    attn_out = outproj_residual(ctx.reshape(H, B * S, D),
                                params["w_out"].reshape(H, D, E), x2d)  # (B*S, E)

    # feed-forward sub-block: norm2 + SwiGLU + fc3 + residual, one kernel
    out = fused_ffn(attn_out, params["norm2_scale"], params["w_fc1"],
                    params["w_fc2"], params["w_fc3"], attn_out)
    return out.reshape(B, S, E), next_cache


if __name__ == "__main__":
    cfg = dict(
        emb_dim=32,
        n_heads=4,
        n_kv_groups=2,
        head_dim=8,
        hidden_dim=64,
        qk_norm=True,
        context_length=16,
        dtype=jnp.bfloat16,
    )
    B, S = 2, 8

    key = jax.random.PRNGKey(0)
    kx, kp = jax.random.split(key)
    x = jax.random.normal(kx, (B, S, cfg["emb_dim"]), dtype=jnp.float32)
    params = init_params(kp, cfg)
    cos, sin = compute_rope_params(cfg["head_dim"], context_length=cfg["context_length"])
    # causal mask (kept only for API parity with the PyTorch reference)
    mask = jnp.triu(jnp.ones((S, S), dtype=bool), k=1)

    # prefill (no cache)
    out, (k_cache, v_cache) = transformer_block_forward(
        params, cfg, x, mask, cos, sin, start_pos=0, cache=None)
    jax.block_until_ready(out)
    assert out.shape == (B, S, cfg["emb_dim"])
    assert k_cache.shape == (B, cfg["n_kv_groups"], S, cfg["head_dim"])
    assert v_cache.shape == (B, cfg["n_kv_groups"], S, cfg["head_dim"])
    assert not bool(jnp.any(jnp.isnan(out.astype(jnp.float32))))

    # single decode step with the KV cache (exercises start_pos / clamped DMA)
    x_step = jax.random.normal(jax.random.PRNGKey(1), (B, 1, cfg["emb_dim"]),
                               dtype=jnp.float32)
    out2, (k2, v2) = transformer_block_forward(
        params, cfg, x_step, None, cos, sin, start_pos=S,
        cache=(k_cache, v_cache))
    jax.block_until_ready(out2)
    assert out2.shape == (B, 1, cfg["emb_dim"])
    assert k2.shape == (B, cfg["n_kv_groups"], S + 1, cfg["head_dim"])
    assert v2.shape == (B, cfg["n_kv_groups"], S + 1, cfg["head_dim"])
    assert not bool(jnp.any(jnp.isnan(out2.astype(jnp.float32))))

    print("KERNEL_OK")
</pallas_src>

<mosaic_0001>
module attributes {stable_mosaic.version = 11 : i64} {
  func.func @_norm_qkv_rope_kernel(%arg0: i32, %arg1: i32, %arg2: i32, %arg3: memref<1x8x32xbf16, #tpu.memory_space<vmem>>, %arg4: memref<1x32xf32, #tpu.memory_space<vmem>>, %arg5: memref<1x8xf32, #tpu.memory_space<vmem>>, %arg6: memref<1x8xf32, #tpu.memory_space<vmem>>, %arg7: memref<8x8xf32, #tpu.memory_space<vmem>>, %arg8: memref<8x8xf32, #tpu.memory_space<vmem>>, %arg9: memref<1x32x8xbf16, #tpu.memory_space<vmem>>, %arg10: memref<1x1x8x8xbf16, #tpu.memory_space<vmem>>, %arg11: memref<8x32xbf16, #tpu.memory_space<vmem>>) attributes {dimension_semantics = [#tpu.dimension_semantics<parallel>, #tpu.dimension_semantics<parallel>, #tpu.dimension_semantics<arbitrary>], iteration_bounds = array<i64: 2, 1, 8>, scalar_prefetch = 0 : i64, scratch_operands = 1 : i64, tpu.core_type = #tpu.core_type<tc>, window_params = [{transform_indices = @transform_0, window_bounds = array<i64: 1, 8, 32>}, {pipeline_mode = #tpu.pipeline_mode<synchronous>, transform_indices = @transform_1, window_bounds = array<i64: 1, 32>}, {pipeline_mode = #tpu.pipeline_mode<synchronous>, transform_indices = @transform_2, window_bounds = array<i64: 1, 8>}, {pipeline_mode = #tpu.pipeline_mode<synchronous>, transform_indices = @transform_3, window_bounds = array<i64: 1, 8>}, {transform_indices = @transform_4, window_bounds = array<i64: 8, 8>}, {transform_indices = @transform_5, window_bounds = array<i64: 8, 8>}, {transform_indices = @transform_6, window_bounds = array<i64: 1, 32, 8>}, {transform_indices = @transform_7, window_bounds = array<i64: 1, 1, 8, 8>}]} {
    %c0_i32 = arith.constant 0 : i32
    %0 = arith.cmpi eq, %arg2, %c0_i32 : i32
    %1 = arith.extui %0 : i1 to i32
    %c0_i32_0 = arith.constant 0 : i32
    %2 = arith.cmpi ne, %1, %c0_i32_0 : i32
    scf.if %2 {
      %c0_8 = arith.constant 0 : index
      %c0_9 = arith.constant 0 : index
      %c0_10 = arith.constant 0 : index
      %13 = vector.load %arg3[%c0_8, %c0_9, %c0_10] : memref<1x8x32xbf16, #tpu.memory_space<vmem>>, vector<1x8x32xbf16>
      %14 = vector.shape_cast %13 : vector<1x8x32xbf16> to vector<8x32xbf16>
      %15 = arith.extf %14 : vector<8x32xbf16> to vector<8x32xf32>
      %16 = arith.mulf %15, %15 : vector<8x32xf32>
      %cst_11 = arith.constant dense<0.000000e+00> : vector<8xf32>
      %17 = vector.multi_reduction <add>, %16, %cst_11 [1] : vector<8x32xf32> to vector<8xf32>
      %18 = vector.shape_cast %17 : vector<8xf32> to vector<8x1xf32>
      %cst_12 = arith.constant 3.200000e+01 : f32
      %19 = vector.broadcast %cst_12 : f32 to vector<8x1xf32>
      %20 = arith.divf %18, %19 : vector<8x1xf32>
      %cst_13 = arith.constant 9.99999997E-7 : f32
      %21 = vector.broadcast %cst_13 : f32 to vector<8x1xf32>
      %22 = arith.addf %20, %21 : vector<8x1xf32>
      %23 = math.rsqrt %22 : vector<8x1xf32>
      %24 = vector.broadcast %23 : vector<8x1xf32> to vector<8x32xf32>
      %25 = arith.mulf %15, %24 : vector<8x32xf32>
      %c0_14 = arith.constant 0 : index
      %c0_15 = arith.constant 0 : index
      %26 = vector.load %arg4[%c0_14, %c0_15] : memref<1x32xf32, #tpu.memory_space<vmem>>, vector<1x32xf32>
      %27 = vector.broadcast %26 : vector<1x32xf32> to vector<8x32xf32>
      %28 = arith.mulf %25, %27 : vector<8x32xf32>
      %29 = arith.truncf %28 : vector<8x32xf32> to vector<8x32xbf16>
      %c0_16 = arith.constant 0 : index
      %c0_17 = arith.constant 0 : index
      %30 = vector.load %arg11[%c0_16, %c0_17] : memref<8x32xbf16, #tpu.memory_space<vmem>>, vector<8x32xbf16>
      tpu.vector_store %arg11[%c0_16, %c0_17], %29 {strides = array<i32>} : memref<8x32xbf16, #tpu.memory_space<vmem>>, vector<8x32xbf16>,
    } else {
    }
    %c0 = arith.constant 0 : index
    %c0_1 = arith.constant 0 : index
    %3 = vector.load %arg11[%c0, %c0_1] : memref<8x32xbf16, #tpu.memory_space<vmem>>, vector<8x32xbf16>
    %c0_2 = arith.constant 0 : index
    %c0_3 = arith.constant 0 : index
    %c0_4 = arith.constant 0 : index
    %4 = vector.load %arg9[%c0_2, %c0_3, %c0_4] : memref<1x32x8xbf16, #tpu.memory_space<vmem>>, vector<1x32x8xbf16>
    %5 = vector.shape_cast %4 : vector<1x32x8xbf16> to vector<32x8xbf16>
    %cst = arith.constant dense<0.000000e+00> : vector<8x8xf32>
    %6 = tpu.matmul %3, %5, %cst {dimension_numbers = #tpu.dot_dimension_numbers<[1], [0], [0], [1], [0, 0, 1, 1], [], []>} : vector<8x32xbf16>, vector<32x8xbf16>, vector<8x8xf32> -> vector<8x8xf32>
    %c6_i32 = arith.constant 6 : i32
    %7 = arith.cmpi sge, %arg2, %c6_i32 : i32
    %8 = arith.extui %7 : i1 to i32
    %c0_i32_5 = arith.constant 0 : i32
    %9 = arith.cmpi ne, %8, %c0_i32_5 : i32
    scf.if %9 {
      %13 = arith.truncf %6 : vector<8x8xf32> to vector<8x8xbf16>
      %c0_8 = arith.constant 0 : index
      %c0_9 = arith.constant 0 : index
      %c0_10 = arith.constant 0 : index
      %c0_11 = arith.constant 0 : index
      %14 = vector.load %arg10[%c0_8, %c0_9, %c0_10, %c0_11] : memref<1x1x8x8xbf16, #tpu.memory_space<vmem>>, vector<1x1x8x8xbf16>
      %15 = vector.shape_cast %14 : vector<1x1x8x8xbf16> to vector<8x8xbf16>
      %16 = vector.shape_cast %13 : vector<8x8xbf16> to vector<1x1x8x8xbf16>
      tpu.vector_store %arg10[%c0_8, %c0_9, %c0_10, %c0_11], %16 {strides = array<i32>} : memref<1x1x8x8xbf16, #tpu.memory_space<vmem>>, vector<1x1x8x8xbf16>,
    } else {
    }
    %c6_i32_6 = arith.constant 6 : i32
    %10 = arith.cmpi slt, %arg2, %c6_i32_6 : i32
    %11 = arith.extui %10 : i1 to i32
    %c0_i32_7 = arith.constant 0 : i32
    %12 = arith.cmpi ne, %11, %c0_i32_7 : i32
    scf.if %12 {
      %c4_i32 = arith.constant 4 : i32
      %13 = arith.cmpi slt, %arg2, %c4_i32 : i32
      %c0_8 = arith.constant 0 : index
      %c0_9 = arith.constant 0 : index
      %14 = vector.load %arg5[%c0_8, %c0_9] : memref<1x8xf32, #tpu.memory_space<vmem>>, vector<1x8xf32>
      %c0_10 = arith.constant 0 : index
      %c0_11 = arith.constant 0 : index
      %15 = vector.load %arg6[%c0_10, %c0_11] : memref<1x8xf32, #tpu.memory_space<vmem>>, vector<1x8xf32>
      %16 = arith.select %13, %14, %15 : vector<1x8xf32>
      %17 = arith.mulf %6, %6 : vector<8x8xf32>
      %cst_12 = arith.constant dense<0.000000e+00> : vector<8xf32>
      %18 = vector.multi_reduction <add>, %17, %cst_12 [1] : vector<8x8xf32> to vector<8xf32>
      %19 = vector.shape_cast %18 : vector<8xf32> to vector<8x1xf32>
      %cst_13 = arith.constant 8.000000e+00 : f32
      %20 = vector.broadcast %cst_13 : f32 to vector<8x1xf32>
      %21 = arith.divf %19, %20 : vector<8x1xf32>
      %cst_14 = arith.constant 9.99999997E-7 : f32
      %22 = vector.broadcast %cst_14 : f32 to vector<8x1xf32>
      %23 = arith.addf %21, %22 : vector<8x1xf32>
      %24 = math.rsqrt %23 : vector<8x1xf32>
      %25 = vector.broadcast %24 : vector<8x1xf32> to vector<8x8xf32>
      %26 = arith.mulf %6, %25 : vector<8x8xf32>
      %27 = vector.broadcast %16 : vector<1x8xf32> to vector<8x8xf32>
      %28 = arith.mulf %26, %27 : vector<8x8xf32>
      %c0_15 = arith.constant 0 : index
      %c0_16 = arith.constant 0 : index
      %29 = vector.load %arg7[%c0_15, %c0_16] : memref<8x8xf32, #tpu.memory_space<vmem>>, vector<8x8xf32>
      %c0_17 = arith.constant 0 : index
      %c0_18 = arith.constant 0 : index
      %30 = vector.load %arg8[%c0_17, %c0_18] : memref<8x8xf32, #tpu.memory_space<vmem>>, vector<8x8xf32>
      %31 = vector.extract_strided_slice %28 {offsets = [0, 0], sizes = [8, 4], strides = [1, 1]} : vector<8x8xf32> to vector<8x4xf32>
      %32 = vector.extract_strided_slice %28 {offsets = [0, 4], sizes = [8, 4], strides = [1, 1]} : vector<8x8xf32> to vector<8x4xf32>
      %cst_19 = arith.constant 0.000000e+00 : f32
      %33 = vector.broadcast %cst_19 : f32 to vector<8x4xf32>
      %34 = arith.subf %33, %32 : vector<8x4xf32>
      %35 = tpu.concatenate %34, %31 in 1 : vector<8x4xf32>, vector<8x4xf32> -> vector<8x8xf32>
      %36 = arith.mulf %28, %29 : vector<8x8xf32>
      %37 = arith.mulf %35, %30 : vector<8x8xf32>
      %38 = arith.addf %36, %37 : vector<8x8xf32>
      %cst_20 = arith.constant 0.353553385 : f32
      %cst_21 = arith.constant 1.000000e+00 : f32
      %39 = arith.select %13, %cst_20, %cst_21 : f32
      %40 = vector.broadcast %39 : f32 to vector<8x8xf32>
      %41 = arith.mulf %38, %40 : vector<8x8xf32>
      %42 = arith.truncf %41 : vector<8x8xf32> to vector<8x8xbf16>
      %c0_22 = arith.constant 0 : index
      %c0_23 = arith.constant 0 : index
      %c0_24 = arith.constant 0 : index
      %c0_25 = arith.constant 0 : index
      %43 = vector.load %arg10[%c0_22, %c0_23, %c0_24, %c0_25] : memref<1x1x8x8xbf16, #tpu.memory_space<vmem>>, vector<1x1x8x8xbf16>
      %44 = vector.shape_cast %43 : vector<1x1x8x8xbf16> to vector<8x8xbf16>
      %45 = vector.shape_cast %42 : vector<8x8xbf16> to vector<1x1x8x8xbf16>
      tpu.vector_store %arg10[%c0_22, %c0_23, %c0_24, %c0_25], %45 {strides = array<i32>} : memref<1x1x8x8xbf16, #tpu.memory_space<vmem>>, vector<1x1x8x8xbf16>,
    } else {
    }
    return
  }
  func.func @transform_0(%arg0: i32, %arg1: i32, %arg2: i32) -> (i32, i32, i32) {
    %c0_i32 = arith.constant 0 : i32
    %c0_i32_0 = arith.constant 0 : i32
    return %arg0, %arg1, %c0_i32 : i32, i32, i32
  }
  func.func @transform_1(%arg0: i32, %arg1: i32, %arg2: i32) -> (i32, i32) {
    %c0_i32 = arith.constant 0 : i32
    %c0_i32_0 = arith.constant 0 : i32
    %c0_i32_1 = arith.constant 0 : i32
    return %c0_i32, %c0_i32_0 : i32, i32
  }
  func.func @transform_2(%arg0: i32, %arg1: i32, %arg2: i32) -> (i32, i32) {
    %c0_i32 = arith.constant 0 : i32
    %c0_i32_0 = arith.constant 0 : i32
    %c0_i32_1 = arith.constant 0 : i32
    return %c0_i32, %c0_i32_0 : i32, i32
  }
  func.func @transform_3(%arg0: i32, %arg1: i32, %arg2: i32) -> (i32, i32) {
    %c0_i32 = arith.constant 0 : i32
    %c0_i32_0 = arith.constant 0 : i32
    %c0_i32_1 = arith.constant 0 : i32
    return %c0_i32, %c0_i32_0 : i32, i32
  }
  func.func @transform_4(%arg0: i32, %arg1: i32, %arg2: i32) -> (i32, i32) {
    %c0_i32 = arith.constant 0 : i32
    %c0_i32_0 = arith.constant 0 : i32
    return %arg1, %c0_i32 : i32, i32
  }
  func.func @transform_5(%arg0: i32, %arg1: i32, %arg2: i32) -> (i32, i32) {
    %c0_i32 = arith.constant 0 : i32
    %c0_i32_0 = arith.constant 0 : i32
    return %arg1, %c0_i32 : i32, i32
  }
  func.func @transform_6(%arg0: i32, %arg1: i32, %arg2: i32) -> (i32, i32, i32) {
    %c0_i32 = arith.constant 0 : i32
    %c0_i32_0 = arith.constant 0 : i32
    %c0_i32_1 = arith.constant 0 : i32
    return %arg2, %c0_i32, %c0_i32_0 : i32, i32, i32
  }
  func.func @transform_7(%arg0: i32, %arg1: i32, %arg2: i32) -> (i32, i32, i32, i32) {
    %c0_i32 = arith.constant 0 : i32
    %c0_i32_0 = arith.constant 0 : i32
    return %arg2, %arg0, %arg1, %c0_i32 : i32, i32, i32, i32
  }
}

</mosaic_0001>

<bundles_post_ra>
// kernel: tpu_custom_call.1
= control target key start
LH: loop header
LB: loop body
LE: loop exit
PB: predicated region body
PF: predicated region fallthrough
CT: control target
= control target key end

     0   :  { %s1060_s0 = inlined_call_operand.vmem [shape: bf16[2,8,32], index: 0, kind: input, shape index: {}]   ;;  %s1061_s1 = inlined_call_operand.vmem [shape: f32[1,32], index: 1, kind: input, shape index: {}]   ;;  %s1062_s2 = inlined_call_operand.vmem [shape: f32[1,8], index: 2, kind: input, shape index: {}]   ;;  %s1063_s3 = inlined_call_operand.vmem [shape: f32[1,8], index: 3, kind: input, shape index: {}]   ;;  %s1064_s4 = inlined_call_operand.vmem [shape: f32[8,8], index: 4, kind: input, shape index: {}]   ;;  %s1065_s5 = inlined_call_operand.vmem [shape: f32[8,8], index: 5, kind: input, shape index: {}]   ;;  %s1066_s6 = inlined_call_operand.vmem [shape: bf16[8,32,8], index: 6, kind: input, shape index: {}]   ;;  %s1067_s7 = inlined_call_operand.hbm [shape: bf16[8,2,8,8], index: 7, kind: output, shape index: {}]  }
   0x1   :  { %1071 = sst [smem:[#allocation9_spill]] %s1060_s0 }
   0x2   :  { %12 = vsyncpa [#allocation4], 0 }
   0x3   :  { %14 = vsyncpa [#allocation4 + $0x1], 0  ;;  %s901_s24 = smov 0   ;;  %s903_s25 = smov 0  }
   0x4   :  { %s905_s26 = smov 0   ;;  %s907_s27 = smov 0  }
   0x5   :  { %s909_s28 = smov 0   ;;  %s911_s29 = smov 0  }
   0x6   :  { %s913_s30 = smov 0   ;;  %s915_s8 = smov 0  }
   0x7 LB: > { %1072 = sst [smem:[#allocation6_spill]] %s850_s30  ;;  %s646_s9 = sadd.s32 4294967295, %s854_s8   ;;  %s854_s8 = sphi %s915_s8, %s20_s8   ;;  %s850_s30 = sphi %s913_s30, %s1080_s30   ;;  %s846_s29 = sphi %s911_s29, %s1085_s29   ;;  %s842_s28 = sphi %s909_s28, %s1078_s28   ;;  %s838_s27 = sphi %s907_s27, %s1084_s27   ;;  %s834_s26 = sphi %s905_s26, %s1083_s26   ;;  %s830_s25 = sphi %s903_s25, %s1082_s25   ;;  %s826_s24 = sphi %s901_s24, %s1081_s24  }
   0x8   : > { %s647_s10 = sadd.s32 4294967294, %s854_s8   ;;  %s32_s11 = sadd.s32 1, %s846_s29 }
   0x9   : > { %p33_p0 = scmp.ge.s32.totalorder %s32_s11, 8  ;;  %s39_s12 = sadd.s32 1, %s850_s30 }
   0xa   : > { %p229_p1 = scmp.ne.s32.totalorder %s834_s26, %s830_s25  ;;  %p230_p2 = scmp.eq.s32.totalorder %s646_s9, 15 }
   0xb   : > { %s1087_s11 = smov (%p33_p0, %s32_s11), 0  ;;  %s1089_s12 = smov (!%p33_p0, %s39_s12), %s850_s30 }
   0xc   : > { %1073 = sst [smem:[#allocation7_spill]] %s1087_s11  ;;  %s212_s13 = ssub.s32 %s846_s29, %s1087_s11 }
   0xd   : > { %p952_p3 = por %p230_p2, %p229_p1  ;;  %p41_p4 = scmp.ge.s32.totalorder %s1089_s12, 2 }
   0xe   : > { %p235_p5 = scmp.ne.s32.totalorder %s830_s25, %s826_s24  ;;  %p236_p6 = scmp.eq.s32.totalorder %s647_s10, 15 }
   0xf   : > { %p652_p7 = scmp.ge.s32.totalorder %s854_s8, 1  ;;  %s1091_s12 = smov (%p41_p4, %s1089_s12), 0 }
  0x10   : > { %1075 = sst [smem:[#allocation8_spill]] %s1091_s12  ;;  %p961_p8 = por %p236_p6, %p235_p5 }
  0x11   : > { %p295_p9 = scmp.lt.s32.totalorder %s854_s8, 17  ;;  %s213_s16 = ssub.s32 %s850_s30, %s1091_s12 }
  0x12   : > { %s219_s17 = sadd.s32 1, %s834_s26  ;;  %s214_s18 = sor.u32 %s213_s16, %s212_s13 }
  0x13   : > { %p296_p10 = pnand %p652_p7, %p295_p9  ;;  %p217_p11 = scmp.eq.s32.totalorder %s214_s18, 0 }
  0x14   : > { %s339_s20 = sand.u32 (!%p296_p10), 1, %s830_s25   ;;  %p342_p12 = scmp.lt.s32.totalorder (!%p296_p10), %s842_s28, 1 }
  0x15   : > { %s970_s19 = scalar_select %p217_p11, %s834_s26, %s219_s17  }
  0x16   : > { %299 = sbr.rel (%p296_p10) target bundleno = 736 (0x2e0), region = 48  ;;  %s653_s21 = sshll.u32 (!%p296_p10), %s339_s20, 2 }
  0x17   : > { %p357_p13 = scmp.lt.s32.totalorder (!%p296_p10), %s838_s27, 7  ;;  %s1077_s0 = sld [smem:[#allocation9_spill]] (!%p296_p10) }
  0x18   : > { %s985_s30 = scalar_lea.vmem (!%p296_p10), [#allocation3], %s653_s21  ;;  %p657_p0 = scmp.ne.s32.totalorder (!%p296_p10), %s838_s27, 0 }
  0x1b   : > { %s343_s22 = scalar_select %p342_p12, %s842_s28, 1 }
  0x1c   : > { %s358_s23 = scalar_select %p357_p13, %s838_s27, 7 }
  0x1d   : > { %s654_s9 = sshll.u32 %s343_s22, 2  ;;  %366 = sbr.rel (%p657_p0) target bundleno = 203 (0xcb), region = 52 }
  0x1e   : > { %s348_s16 = scalar_lea.vmem %s1077_s0, %s654_s9  ;;  %s669_s17 = sshll.u32 %s358_s23, 4 }
  0x1f   : > { %s361_s11 = scalar_lea.vmem %s1066_s6, %s669_s17 }
  0x22   : > { %v367_v0 = vld [vmem:[%s348_s16] sm:$0xf]  ;;  %vm370_vm0 = vcmask 261120   ;;  %vm388_vm1 = vcmask 257024  }
  0x23   : > { %v368_v1 = vunpack.c.l.bf16 %v367_v0  ;;  %v658_v8 = vld [vmem:[%s1061_s1] ss:$0 sm:$0xff] }
  0x25   : > { %v369_v2 = vmul.f32 %v368_v1, %v368_v1 }
  0x27   : > { %v371_v3 = vsel %vm370_vm0, %v369_v2, 0.0 }
  0x28   : > { %372 = vadd.xlane.f32.xlu0 %v371_v3 }
  0xb1   : > { %v373_v4 = vpop.xlane.xlu0 %372 }
  0xb2   : > { %v375_v5 = vmul.f32 0.03125, %v373_v4 }
  0xb4   : > { %v376_v6 = vadd.f32 1e-06, %v375_v5 }
  0xb6   : > { %756 = vrsqrt.f32 %v376_v6 }
  0xc3   : > { %v757_v7 = vpop.eup %756 }
  0xc4   : > { %v378_v9 = vmul.f32 %v757_v7, %v368_v1 }
  0xc6   : > { %v386_v10 = vmul.f32 %v658_v8, %v378_v9 }
  0xc8   : > { %v387_v11 = vpack.c.bf16 %v386_v10, %v386_v10 }
  0xca   : > { %389 = vst.msk [vmem:[#allocation2] sm:$0xf] %vm388_vm1, %v387_v11 }
  0xcb PF: > { %v758_v12 = vld [vmem:[%s361_s11 + $0x8] sm:$0xff]   ;;  %v856_v13 = vmov 0.0   ;;  %v759_v14 = vld [vmem:[%s361_s11] sm:$0xff]   ;;  %vm857_vm2 = vmmov 0   ;;  %vm407_vm3 = vcmask 261120   ;;  %p662_p1 = scmp.lt.s32.totalorder %s838_s27, 6 }
  0xcc   : > { %673 = vmatprep.subr.bf16.mxu0 %v856_v13  ;;  %677 = vmatprep.mubr.msk.bf16.mxu0 %vm857_vm2, %v856_v13 }
  0xcd   : > { %674 = vmatpush3.bf16.msra.mxu0 %v758_v12 }
  0xce   : > { %675 = vmatprep.subr.bf16.mxu0 %v856_v13 }
  0xd1   : > { %676 = vmatpush3.bf16.msra.mxu0 %v759_v14  ;;  %v390_v15 = vld [vmem:[#allocation2] sm:$0xf] }
  0xd4   : > { %678 = vmatmul.mubr.msk.bf16.vlgmr.msra.gmra.mxu0 %vm407_vm3, %v390_v15 }
 0x194   : > { %v445_v16 = vpop.f32.mrf.mxu0 }
 0x196   : > { %v679_v17 = vpop.f32.mrf.mxu0  ;;  %454 = sbr.rel (%p662_p1) target bundleno = 414 (0x19e), region = 56 }
 0x198   : > { %v448_v18 = vpop.f32.mrf.mxu0 }
 0x19a   : > { %v680_v19 = vpop.f32.mrf.mxu0 }
 0x19b   : > { %v455_v20 = vpack.c.bf16 %v445_v16, %v445_v16  ;;  %vm456_vm4 = vcmask 60416  }
 0x19d   : > { %457 = vst.msk [vmem:[%s985_s30] sm:$0xf] %vm456_vm4, %v455_v20 }
 0x19e PF: > { %p663_p2 = scmp.ge.s32.totalorder %s838_s27, 6 }
 0x19f   : > { %p462_p4 = scmp.lt.s32.totalorder (!%p663_p2), %s838_s27, 4  ;;  %s858_s13 = smov (!%p663_p2), 4  }
 0x1a0   : > { %461 = sbr.rel (%p663_p2) target bundleno = 711 (0x2c7), region = 60  ;;  %s859_s16 = smov (!%p663_p2), 124  }
 0x1a5   : > { %v469_v21 = vmul.f32 %v445_v16, %v445_v16  ;;  %vm470_vm5 = vcmask 64512   ;;  %s465_s11 = scalar_select %p462_p4, 1, 0  ;;  %v480_v26 = vlaneseq  ;;  %v463_v29 = vld [vmem:[%s1062_s2] sm:$0x1]  ;;  %vm497_vm7 = vcmask 31744  }
 0x1a6   : > { %v464_v30 = vld [vmem:[%s1063_s3] sm:$0x1]  ;;  %vm506_vm8 = vcmask 60416  }
 0x1a7   : > { %v471_v22 = vsel %vm470_vm5, %v469_v21, 0.0  ;;  %v466_v27 = vstv %s465_s11  ;;  %v481_v28 = vshrl.u32 %v480_v26, 7  ;;  %v486_v38 = vld [vmem:[%s1064_s4] sm:$0xff]  ;;  %s502_s11 = scalar_select %p462_p4, 0.35355338, 1.0 }
 0x1a8   : > { %472 = vadd.xlane.f32.xlu0 %v471_v22  ;;  %vm467_vm6 = vcmp.eq.s32.totalorder %v466_v27, 1  ;;  %v487_v39 = vld [vmem:[%s1065_s5] sm:$0xff] }
 0x1a9   : > { %v482_v31 = vsub.s32 0, %v481_v28  ;;  %v468_v32 = vsel %vm467_vm6, %v463_v29, %v464_v30  ;;  %v503_v45 = vstv %s502_s11 }
 0x1ab   : > { %v483_v33 = vrot.slane %v468_v32, %v482_v31 }
 0x231   : > { %v473_v23 = vpop.xlane.xlu0 %472 }
 0x232   : > { %v475_v24 = vmul.f32 0.125, %v473_v23 }
 0x234   : > { %v476_v25 = vadd.f32 1e-06, %v475_v24 }
 0x236   : > { %760 = vrsqrt.f32 %v476_v25 }
 0x243   : > { %v761_v34 = vpop.eup %760 }
 0x244   : > { %v478_v35 = vmul.f32 %v761_v34, %v445_v16 }
 0x246   : > { %v485_v36 = vmul.f32 %v483_v33, %v478_v35 }
 0x248   : > { %494 = vrot.lane.b32.xlu1 %v485_v36, %s858_s13  ;;  %v488_v37 = vsub.f32 0.0, %v485_v36  ;;  %v499_v43 = vmul.f32 %v486_v38, %v485_v36 }
 0x24a   : > { %490 = vrot.lane.b32.xlu0 %v488_v37, %s859_s16 }
 0x2ba   : > { %v495_v40 = vpop.permute.xlu1 %494 }
 0x2bc   : > { %v491_v41 = vpop.permute.xlu0 %490 }
 0x2bd   : > { %v498_v42 = vsel %vm497_vm7, %v491_v41, %v495_v40 }
 0x2be   : > { %v500_v44 = vmul.f32 %v498_v42, %v487_v39 }
 0x2c0   : > { %v501_v46 = vadd.f32 %v500_v44, %v499_v43 }
 0x2c2   : > { %v504_v47 = vmul.f32 %v503_v45, %v501_v46 }
 0x2c4   : > { %v505_v48 = vpack.c.bf16 %v504_v47, %v504_v47 }
 0x2c6   : > { %507 = vst.msk [vmem:[%s985_s30] sm:$0xf] %vm506_vm8, %v505_v48 }
 0x2c7 PF: > { %s665_s12 = sshll.u32 %s838_s27, 1  ;;  %s525_s9 = sshll.u32 %s985_s30, 4  ;;  %s526_s9 = int_to_ptr.vmem [resolvable:$true] %s525_s9 }
 0x2c8   : > { %s521_s21 = sadd.s32 %s842_s28, %s665_s12  ;;  %s509_s18 = scalar_lea.sflag [#allocation4], %s339_s20 }
 0x2c9   : > { %s666_s10 = sshll.u32 %s521_s21, 6  ;;  %s762_s22 = scalar_lea.vmem %s526_s9, 64 }
 0x2ca   : > { %s523_s17 = scalar_lea.hbm %s1067_s7, %s666_s10  ;;  %p763_p5 = scmp.ne.s32.totalorder %s526_s9, %s762_s22 }
 0x2cb   : > { %s860_s23 = smov [#allocation3]  }
 0x2cc   : > { %p764_p6 = pnand %p763_p5, %p952_p3  ;;  %s766_s11 = sshll.u32 %s860_s23, 4  ;;  %s767_s11 = int_to_ptr.vmem [resolvable:$false] %s766_s11 }
 0x2cd   : > { %s768_s0 = scalar_lea.vmem %s767_s11, 128  ;;  %p769_p9 = scmp.lt.s32.totalorder %s526_s9, %s767_s11 }
 0x2ce   : > { %p765_p7 = pneg %p764_p6  ;;  %p770_p10 = scmp.lt.s32.totalorder %s768_s0, %s762_s22 }
 0x2d0   : > { %p771_p11 = por %p770_p10, %p769_p9 }
 0x2d2   : > { %p772_p12 = pnand %p771_p11, %p765_p7 }
 0x2d4   : > { %775 = shalt.err (!%p772_p12)
}
 0x2d5   : > { %s776_s27 = scalar_lea.hbm %s523_s17, 64  ;;  %s780_s20 = scalar_lea.hbm %s1067_s7, 1024 }
 0x2d6   : > { %p777_p13 = scmp.ne.s32.totalorder %s523_s17, %s776_s27  ;;  %p781_p2 = scmp.lt.s32.totalorder %s523_s17, %s1067_s7 }
 0x2d7   : > { %p782_p4 = scmp.lt.s32.totalorder %s780_s20, %s776_s27 }
 0x2d8   : > { %p778_p0 = pnand %p777_p13, %p952_p3 }
 0x2d9   : > { %p783_p5 = por %p782_p4, %p781_p2 }
 0x2da   : > { %p779_p1 = pneg %p778_p0 }
 0x2dc   : > { %p784_p6 = pnand %p783_p5, %p779_p1 }
 0x2de   : > { %787 = shalt.err (!%p784_p6)
}
 0x2df   : > { %681 = dma.vmem_to_hbm [thread:$0]  (%p952_p3), %s526_s9, 64, %s523_s17, %s509_s18  }
 0x2e0 PF: > { %p687_p7 = scmp.ge.s32.totalorder %s854_s8, 2  ;;  %s537_s0 = sand.u32 1, %s826_s24  }
 0x2e1   : > { %s538_s10 = scalar_lea.sflag [#allocation4], %s537_s0 }
 0x2e2   : > { %p684_p9 = pnand %p687_p7, %p961_p8 }
 0x2e4   : > { %p685_p10 = pneg %p684_p9 }
 0x2e6   : > { %821 = dma.done.wait (%p685_p10), %s538_s10, 64  }
 0x2e7   : > { %823 = vsyncadd (%p685_p10), %s538_s10, 4294967232  ;;  %s20_s8 = sadd.s32 1, %s854_s8   ;;  %s1078_s28 = sld [smem:[#allocation6_spill]] }
 0x2e8   : > { %p17_p11 = scmp.ge.s32.totalorder %s20_s8, 18   ;;  %s1079_s14 = sld [smem:[#allocation7_spill]] }
 0x2e9   : > { %s1080_s30 = sld [smem:[#allocation8_spill]]  ;;  %s1081_s24 = smov %s830_s25 }
 0x2ea   : > { %s1082_s25 = smov %s834_s26  ;;  %s1083_s26 = smov %s970_s19 }
 0x2eb   : > { %s1084_s27 = smov %s846_s29  ;;  %19 = sbr.rel (!%p17_p11) target bundleno = 7 (0x7), region = 104 }
 0x2ee   : > { %s1085_s29 = smov %s1079_s14 }
 0x2f0   :  { %543 = vsyncpa [#allocation4], 1 }
 0x2f1   :  { %545 = vsyncpa [#allocation4 + $0x1], 1 }

</bundles_post_ra>
